<compile_context>
chip_gen: v7x
topology: tpu7x:2x2x1
jax: 0.10.0
libtpu: 0.0.40
codegen_flags: <defaults>
</compile_context>

<pallas_src>
import numpy as np
import jax
import jax.numpy as jnp
from jax.experimental import pallas as pl
from jax.experimental.pallas import tpu as pltpu

N_QUBITS = 5                  # measure_affinity(x, 5) -> 5 measured qubits
DIM = 2 ** N_QUBITS           # 32
N_MEAS = 5
N_PAD = 128                   # lane-dense output width (5 real cols + zero pad)
K_DIM = 2 * DIM * DIM         # 2048 = flattened Re||Im density-matrix length

# TODO(synk): measure_affinity / rx / ry / rz / gate_expand_* helpers are not in the
# provided module; standard definitions from this repo family are used and
# measure_affinity(x, 5) is assumed to return Re[Tr(Z_m rho)] for m in range(5).


# --------------------- circuit construction (plain JAX glue) ---------------------

def _rx(phi):
    c = jnp.cos(phi / 2).astype(jnp.complex64)
    s = jnp.sin(phi / 2).astype(jnp.complex64)
    return jnp.stack([jnp.stack([c, -1j * s]), jnp.stack([-1j * s, c])])


def _ry(phi):
    c = jnp.cos(phi / 2).astype(jnp.complex64)
    s = jnp.sin(phi / 2).astype(jnp.complex64)
    return jnp.stack([jnp.stack([c, -s]), jnp.stack([s, c])])


def _rz(phi):
    phic = phi.astype(jnp.complex64)
    e_m = jnp.exp(-1j * phic / 2)
    e_p = jnp.exp(1j * phic / 2)
    zero = jnp.zeros((), jnp.complex64)
    return jnp.stack([jnp.stack([e_m, zero]), jnp.stack([zero, e_p])])


def _cnot():
    return jnp.array([[1, 0, 0, 0],
                      [0, 1, 0, 0],
                      [0, 0, 0, 1],
                      [0, 0, 1, 0]], dtype=jnp.complex64)


def _gate_expand_1toN(u, n, target):
    g = jnp.kron(jnp.eye(2 ** target, dtype=jnp.complex64), u)
    return jnp.kron(g, jnp.eye(2 ** (n - target - 1), dtype=jnp.complex64))


def _gate_expand_2toN(u, n, targets):
    ctrl = targets[0]  # adjacent pair [q-1, q]
    g = jnp.kron(jnp.eye(2 ** ctrl, dtype=jnp.complex64), u)
    return jnp.kron(g, jnp.eye(2 ** (n - ctrl - 2), dtype=jnp.complex64))


def _gate_sequence_product(gates, n):
    u = jnp.eye(2 ** n, dtype=jnp.complex64)
    for g in gates:         # left-to-right application
        u = g @ u
    return u


def qulinear_unitary(weight, n_qubits, w_mul):
    """QuLinear.layer(): build the circuit unitary U from the 30 weights."""
    w = weight * w_mul
    cir = []
    for q in range(n_qubits):
        cir.append(_gate_expand_1toN(_rx(w[q]), n_qubits, q))
        cir.append(_gate_expand_1toN(_ry(w[q + 10]), n_qubits, q))
        cir.append(_gate_expand_1toN(_rz(w[q + 20]), n_qubits, q))
    for q in range(1, n_qubits):
        cir.append(_gate_expand_2toN(_cnot(), n_qubits, [q - 1, q]))
    for q in range(n_qubits):
        cir.append(_gate_expand_1toN(_rx(-w[q]), n_qubits, q))
        cir.append(_gate_expand_1toN(_ry(-w[q + 10]), n_qubits, q))
        cir.append(_gate_expand_1toN(_rz(-w[q + 20]), n_qubits, q))
    for q in range(1, n_qubits):
        cir.append(_gate_expand_2toN(_cnot(), n_qubits, [q - 1, q]))
    return _gate_sequence_product(cir, n_qubits)


def _z_diag(n, target):
    """Diagonal of kron(I_2^t, Z, I_2^(n-t-1)) as float32 (D,)."""
    d = jnp.ones((2 ** target,), jnp.float32)
    d = jnp.kron(d, jnp.array([1.0, -1.0], jnp.float32))
    return jnp.kron(d, jnp.ones((2 ** (n - target - 1),), jnp.float32))


# ------------------------------- Pallas kernel ----------------------------------

def _qulinear_kernel(w_ref, x_ref, o_ref):
    # One lane-dense streaming GEMM per batch tile:
    #   (TB, 2*D*D) @ (2*D*D, N_PAD) -> (TB, N_PAD)
    o_ref[...] = jnp.dot(x_ref[...], w_ref[...],
                         preferred_element_type=jnp.float32)


def qulinear_forward(u, x, block_batch=512):
    """forward(x): U @ x @ dag(U) followed by Pauli-Z measurement of 5 qubits."""
    batch = x.shape[0]

    # ---- hoist U-dependent work out of the batch loop (5 tiny 32x32 products) ----
    zt = jnp.stack([_z_diag(N_QUBITS, m) for m in range(N_MEAS)], axis=1)   # (D, N_MEAS)
    # M_m = U^dag Z_m U  (Z_m diagonal): M[m, a, b] = sum_k conj(U[k,a]) z[k,m] U[k,b]
    m_ops = jnp.einsum('ka,km,kb->mab',
                       jnp.conj(u), zt.astype(jnp.complex64), u)           # (N_MEAS, D, D)
    # out[n, m] = sum_{p,q} xr[n,p,q]*Re(M[m,q,p]) - xi[n,p,q]*Im(M[m,q,p])
    wr = jnp.transpose(jnp.real(m_ops), (2, 1, 0)).reshape(DIM * DIM, N_MEAS)
    wi = -jnp.transpose(jnp.imag(m_ops), (2, 1, 0)).reshape(DIM * DIM, N_MEAS)
    w = jnp.concatenate([wr, wi], axis=0).astype(jnp.float32)               # (2048, 5)
    w = jnp.pad(w, ((0, 0), (0, N_PAD - N_MEAS)))                           # (2048, 128)

    # ---- flatten rho into lane-dense (B, 2048) real feature vectors ----
    xr = jnp.real(x).astype(jnp.float32).reshape(batch, DIM * DIM)
    xi = jnp.imag(x).astype(jnp.float32).reshape(batch, DIM * DIM)
    xf = jnp.concatenate([xr, xi], axis=1)                                   # (B, 2048)

    # ---- batch tiling: many density matrices per grid step ----
    if batch <= block_batch:
        tb = max(8, ((batch + 7) // 8) * 8)
    else:
        tb = block_batch
    b_pad = pl.cdiv(batch, tb) * tb
    if b_pad != batch:
        xf = jnp.pad(xf, ((0, b_pad - batch), (0, 0)))

    out = pl.pallas_call(
        _qulinear_kernel,
        out_shape=jax.ShapeDtypeStruct((b_pad, N_PAD), jnp.float32),
        grid_spec=pltpu.PrefetchScalarGridSpec(
            num_scalar_prefetch=0,
            grid=(b_pad // tb,),
            in_specs=[
                pl.BlockSpec((K_DIM, N_PAD), lambda i: (0, 0)),   # W resident (fetched once)
                pl.BlockSpec((tb, K_DIM), lambda i: (i, 0)),      # rho tile, streamed
            ],
            out_specs=pl.BlockSpec((tb, N_PAD), lambda i: (i, 0)),
        ),
        compiler_params=pltpu.CompilerParams(
            dimension_semantics=("parallel",),
        ),
    )(w, xf)
    return out[:batch, :N_MEAS]                                              # (B, N_MEAS)


# ---------------------------------- driver ---------------------------------------

if __name__ == "__main__":
    key = jax.random.PRNGKey(0)
    kw, ka, kb = jax.random.split(key, 3)

    # QuLinear.__init__ (use_wscale=True, lrmul=1, gain=sqrt(2))
    gain, lrmul = 2 ** 0.5, 1.0
    he_std = gain * 5 ** (-0.5)
    init_std = 1.0 / lrmul
    w_mul = he_std * lrmul
    weight = jax.random.uniform(kw, (30,), minval=0.0, maxval=2 * np.pi,
                                dtype=jnp.float32) * init_std

    # deterministic input: batch of density matrices (Hermitian, PSD, trace 1)
    batch = 2
    a = (jax.random.normal(ka, (batch, DIM, DIM), jnp.float32)
         + 1j * jax.random.normal(kb, (batch, DIM, DIM), jnp.float32))
    rho = a @ jnp.conj(jnp.swapaxes(a, -1, -2))
    rho = (rho / jnp.trace(rho, axis1=-2, axis2=-1)[:, None, None]).astype(jnp.complex64)

    # build circuit unitary (QuLinear.layer)
    u = qulinear_unitary(weight, N_QUBITS, w_mul)

    # Pallas forward
    out = jax.block_until_ready(qulinear_forward(u, rho))

    # pure-JAX reference check
    y = u @ rho @ jnp.conj(u).T
    diag = jnp.real(jnp.diagonal(y, axis1=-2, axis2=-1))           # (B, D)
    zt_ref = jnp.stack([_z_diag(N_QUBITS, m) for m in range(N_MEAS)], axis=1)
    ref = diag @ zt_ref                                            # (B, N_MEAS)
    if not np.allclose(np.asarray(out), np.asarray(ref), atol=1e-4, rtol=1e-3):
        raise AssertionError("Pallas output does not match JAX reference")

    print("KERNEL_OK")
</pallas_src>

<mosaic_0001>
module attributes {stable_mosaic.version = 11 : i64} {
  func.func @_qulinear_kernel(%arg0: i32, %arg1: memref<2048x128xf32, #tpu.memory_space<vmem>>, %arg2: memref<8x2048xf32, #tpu.memory_space<vmem>>, %arg3: memref<8x128xf32, #tpu.memory_space<vmem>>) attributes {dimension_semantics = [#tpu.dimension_semantics<parallel>], iteration_bounds = array<i64: 1>, scalar_prefetch = 0 : i64, scratch_operands = 0 : i64, tpu.core_type = #tpu.core_type<tc>, window_params = [{pipeline_mode = #tpu.pipeline_mode<synchronous>, transform_indices = @transform_0, window_bounds = array<i64: 2048, 128>}, {transform_indices = @transform_1, window_bounds = array<i64: 8, 2048>}, {transform_indices = @transform_2, window_bounds = array<i64: 8, 128>}]} {
    %c0 = arith.constant 0 : index
    %c0_0 = arith.constant 0 : index
    %0 = vector.load %arg2[%c0, %c0_0] : memref<8x2048xf32, #tpu.memory_space<vmem>>, vector<8x2048xf32>
    %c0_1 = arith.constant 0 : index
    %c0_2 = arith.constant 0 : index
    %1 = vector.load %arg1[%c0_1, %c0_2] : memref<2048x128xf32, #tpu.memory_space<vmem>>, vector<2048x128xf32>
    %cst = arith.constant dense<0.000000e+00> : vector<8x128xf32>
    %2 = tpu.matmul %0, %1, %cst {dimension_numbers = #tpu.dot_dimension_numbers<[1], [0], [0], [1], [0, 0, 1, 1], [], []>} : vector<8x2048xf32>, vector<2048x128xf32>, vector<8x128xf32> -> vector<8x128xf32>
    %c0_3 = arith.constant 0 : index
    %c0_4 = arith.constant 0 : index
    %3 = vector.load %arg3[%c0_3, %c0_4] : memref<8x128xf32, #tpu.memory_space<vmem>>, vector<8x128xf32>
    tpu.vector_store %arg3[%c0_3, %c0_4], %2 {strides = array<i32>} : memref<8x128xf32, #tpu.memory_space<vmem>>, vector<8x128xf32>,
    return
  }
  func.func @transform_0(%arg0: i32) -> (i32, i32) {
    %c0_i32 = arith.constant 0 : i32
    %c0_i32_0 = arith.constant 0 : i32
    %c0_i32_1 = arith.constant 0 : i32
    return %c0_i32, %c0_i32_0 : i32, i32
  }
  func.func @transform_1(%arg0: i32) -> (i32, i32) {
    %c0_i32 = arith.constant 0 : i32
    %c0_i32_0 = arith.constant 0 : i32
    return %arg0, %c0_i32 : i32, i32
  }
  func.func @transform_2(%arg0: i32) -> (i32, i32) {
    %c0_i32 = arith.constant 0 : i32
    %c0_i32_0 = arith.constant 0 : i32
    return %arg0, %c0_i32 : i32, i32
  }
}

</mosaic_0001>

<bundles_post_ra>
// kernel: tpu_custom_call.1
= control target key start
LH: loop header
LB: loop body
LE: loop exit
PB: predicated region body
PF: predicated region fallthrough
CT: control target
= control target key end

     0   :  { %7 = vsyncpa [#allocation3], 0  ;;  %s1556_s0 = inlined_call_operand.hbm [shape: f32[2048,128], index: 0, kind: input, shape index: {}]   ;;  %s1557_s1 = inlined_call_operand.hbm [shape: f32[8,2048], index: 1, kind: input, shape index: {}]   ;;  %s1558_s2 = inlined_call_operand.hbm [shape: f32[8,128], index: 2, kind: output, shape index: {}]  }
   0x1   :  { %8 = vsyncpa [#allocation6], 0 }
   0x2   :  { %9 = vsyncpa [#allocation4], 0  ;;  %s1500_s9 = smov [#allocation2]   ;;  %s1428_s13 = scalar_lea.hbm %s1556_s0, 32768 }
   0x3   :  { %s15_s10 = sshll.u32 %s1500_s9, 4  ;;  %p1429_p0 = scmp.ne.s32.totalorder %s1556_s0, %s1428_s13  ;;  %s16_s10 = int_to_ptr.vmem [resolvable:$true] %s15_s10 }
   0x4   :  { %p1432_p1 = scmp.lt.u32.totalorder %s1428_s13, %s1556_s0 }
   0x6   :  { %p1434_p2 = pnand %p1432_p1, %p1429_p0 }
   0x8   :  { %1437 = shalt.err (!%p1434_p2)
}
   0x9   :  { %s1438_s18 = scalar_lea.vmem %s16_s10, 32768  ;;  %p1443_p4 = scmp.lt.s32.totalorder %s16_s10, %s16_s10 }
   0xa   :  { %p1439_p3 = scmp.ne.s32.totalorder %s16_s10, %s1438_s18  ;;  %p1444_p5 = scmp.lt.s32.totalorder %s1438_s18, %s1438_s18 }
   0xc   :  { %p1445_p6 = por %p1444_p5, %p1443_p4 }
   0xe   :  { %p1446_p7 = pnand %p1445_p6, %p1439_p3 }
  0x10   :  { %1449 = shalt.err (!%p1446_p7)
}
  0x11   :  { %s1501_s19 = smov 128   ;;  %s1502_s20 = smov 8  }
  0x12   :  { %21 = dma.hbm_to_vmem [thread:$0]  %s1556_s0, 32768, %s16_s10, [#allocation3], %s1501_s19, %s1501_s19, %s1502_s20  }
  0x13   :  { %s1503_s23 = smov [#allocation5]   ;;  %s1450_s27 = scalar_lea.hbm %s1557_s1, 2048 }
  0x14   :  { %s28_s24 = sshll.u32 %s1503_s23, 4  ;;  %p1451_p8 = scmp.ne.s32.totalorder %s1557_s1, %s1450_s27  ;;  %s29_s24 = int_to_ptr.vmem [resolvable:$true] %s28_s24 }
  0x15   :  { %p1454_p9 = scmp.lt.u32.totalorder %s1450_s27, %s1557_s1 }
  0x17   :  { %p1456_p10 = pnand %p1454_p9, %p1451_p8 }
  0x19   :  { %1459 = shalt.err (!%p1456_p10)
}
  0x1a   :  { %s1460_s4 = scalar_lea.vmem %s29_s24, 2048  ;;  %p1465_p12 = scmp.lt.s32.totalorder %s29_s24, %s29_s24 }
  0x1b   :  { %p1461_p11 = scmp.ne.s32.totalorder %s29_s24, %s1460_s4  ;;  %p1466_p13 = scmp.lt.s32.totalorder %s1460_s4, %s1460_s4 }
  0x1d   :  { %p1467_p0 = por %p1466_p13, %p1465_p12 }
  0x1f   :  { %p1468_p1 = pnand %p1467_p0, %p1461_p11 }
  0x21   :  { %1471 = shalt.err (!%p1468_p1)
}
  0x22   :  { %31 = dma.hbm_to_vmem [thread:$0]  %s1557_s1, 2048, %s29_s24, [#allocation6]  }
  0x23   :  { %1494 = dma.done.wait [#allocation3], 32768  }
  0x24   :  { %1495 = vsyncadd [#allocation3], 4294934528 }
  0x25   :  { %1496 = dma.done.wait [#allocation6], 2048  }
  0x26   :  { %1497 = vsyncadd [#allocation6], 4294965248  ;;  %v70_v0 = vld [vmem:[#allocation2 + $0x80] sm:$0xff]  ;;  %v71_v1 = vld [vmem:[#allocation2 + $0x88] sm:$0xff]  ;;  %s1504_s1 = smov [#allocation7]  }
  0x27   :  { %v102_v2 = vld [vmem:[#allocation2 + $0x180] sm:$0xff]  ;;  %v1167_v3 = vpack.c.bf16 %v71_v1, %v70_v0  ;;  %v103_v4 = vld [vmem:[#allocation2 + $0x188] sm:$0xff]  ;;  %v72_v11 = vld [vmem:[#allocation2 + $0x90] sm:$0xff]  ;;  %s877_s6 = sshll.u32 %s1504_s1, 4  ;;  %s878_s6 = int_to_ptr.vmem [resolvable:$true] %s877_s6 }
  0x28   :  { %v54_v5 = vld [vmem:[#allocation2] sm:$0xff]  ;;  %v55_v6 = vld [vmem:[#allocation2 + $0x8] sm:$0xff]  ;;  %v1199_v7 = vpack.c.bf16 %v103_v4, %v102_v2  ;;  %v73_v13 = vld [vmem:[#allocation2 + $0x98] sm:$0xff]  ;;  %s1472_s7 = scalar_lea.vmem %s878_s6, 128  ;;  %p1477_p3 = scmp.lt.s32.totalorder %s878_s6, %s878_s6 }
  0x29   :  { %v1169_v8 = vpack.c.bf16 %v55_v6, %v54_v5  ;;  %v86_v9 = vld [vmem:[#allocation2 + $0x100] sm:$0xff]  ;;  %v87_v10 = vld [vmem:[#allocation2 + $0x108] sm:$0xff]  ;;  %1168 = vmatprep.subr.bf16.mxu0 %v1167_v3  ;;  %v104_v14 = vld [vmem:[#allocation2 + $0x190] sm:$0xff]  ;;  %v1171_v16 = vpack.c.bf16 %v73_v13, %v72_v11  ;;  %p1473_p2 = scmp.ne.s32.totalorder %s878_s6, %s1472_s7  ;;  %p1478_p4 = scmp.lt.s32.totalorder %s1472_s7, %s1472_s7 }
  0x2a   :  { %v1201_v12 = vpack.c.bf16 %v87_v10, %v86_v9  ;;  %v105_v15 = vld [vmem:[#allocation2 + $0x198] sm:$0xff]  ;;  %1200 = vmatprep.subr.bf16.mxu1 %v1199_v7  ;;  %v56_v18 = vld [vmem:[#allocation2 + $0x10] sm:$0xff]  ;;  %v74_v23 = vld [vmem:[#allocation2 + $0xa0] sm:$0xff] }
  0x2b   :  { %1170 = vmatpush3.bf16.msra.mxu0 %v1169_v8  ;;  %v1203_v17 = vpack.c.bf16 %v105_v15, %v104_v14  ;;  %v57_v19 = vld [vmem:[#allocation2 + $0x18] sm:$0xff]  ;;  %v88_v20 = vld [vmem:[#allocation2 + $0x110] sm:$0xff]  ;;  %v75_v24 = vld [vmem:[#allocation2 + $0xa8] sm:$0xff]  ;;  %p1479_p5 = por %p1478_p4, %p1477_p3 }
  0x2c   :  { %1202 = vmatpush3.bf16.msra.mxu1 %v1201_v12  ;;  %v1173_v21 = vpack.c.bf16 %v57_v19, %v56_v18  ;;  %v89_v22 = vld [vmem:[#allocation2 + $0x118] sm:$0xff]  ;;  %1172 = vmatprep.subr.bf16.mxu0 %v1171_v16  ;;  %v1175_v26 = vpack.c.bf16 %v75_v24, %v74_v23  ;;  %v106_v27 = vld [vmem:[#allocation2 + $0x1a0] sm:$0xff]  ;;  %v107_v28 = vld [vmem:[#allocation2 + $0x1a8] sm:$0xff] }
  0x2d   :  { %1204 = vmatprep.subr.bf16.mxu1 %v1203_v17  ;;  %v1205_v25 = vpack.c.bf16 %v89_v22, %v88_v20  ;;  %v58_v29 = vld [vmem:[#allocation2 + $0x20] sm:$0xff]  ;;  %v1207_v30 = vpack.c.bf16 %v107_v28, %v106_v27  ;;  %v59_v31 = vld [vmem:[#allocation2 + $0x28] sm:$0xff]  ;;  %v76_v35 = vld [vmem:[#allocation2 + $0xb0] sm:$0xff]  ;;  %p1480_p6 = pnand %p1479_p5, %p1473_p2 }
  0x2e   :  { %v90_v32 = vld [vmem:[#allocation2 + $0x120] sm:$0xff]  ;;  %v91_v33 = vld [vmem:[#allocation2 + $0x128] sm:$0xff]  ;;  %v1177_v34 = vpack.c.bf16 %v59_v31, %v58_v29  ;;  %v77_v36 = vld [vmem:[#allocation2 + $0xb8] sm:$0xff] }
  0x2f   :  { %1174 = vmatpush3.bf16.msra.mxu0 %v1173_v21  ;;  %v108_v37 = vld [vmem:[#allocation2 + $0x1b0] sm:$0xff]  ;;  %v1209_v38 = vpack.c.bf16 %v91_v33, %v90_v32  ;;  %v1179_v39 = vpack.c.bf16 %v77_v36, %v76_v35  ;;  %v109_v40 = vld [vmem:[#allocation2 + $0x1b8] sm:$0xff]  ;;  %v78_v46 = vld [vmem:[#allocation2 + $0xc0] sm:$0xff] }
  0x30   :  { %1206 = vmatpush3.bf16.msra.mxu1 %v1205_v25  ;;  %1176 = vmatprep.subr.bf16.mxu0 %v1175_v26  ;;  %v60_v41 = vld [vmem:[#allocation2 + $0x30] sm:$0xff]  ;;  %v61_v42 = vld [vmem:[#allocation2 + $0x38] sm:$0xff]  ;;  %v1211_v43 = vpack.c.bf16 %v109_v40, %v108_v37  ;;  %v79_v47 = vld [vmem:[#allocation2 + $0xc8] sm:$0xff] }
  0x31   :  { %1208 = vmatprep.subr.bf16.mxu1 %v1207_v30  ;;  %v92_v44 = vld [vmem:[#allocation2 + $0x130] sm:$0xff]  ;;  %v93_v45 = vld [vmem:[#allocation2 + $0x138] sm:$0xff]  ;;  %v110_v48 = vld [vmem:[#allocation2 + $0x1c0] sm:$0xff]  ;;  %v1181_v50 = vpack.c.bf16 %v61_v42, %v60_v41  ;;  %v1183_v52 = vpack.c.bf16 %v79_v47, %v78_v46 }
  0x32   :  { %v111_v49 = vld [vmem:[#allocation2 + $0x1c8] sm:$0xff]  ;;  %v1213_v51 = vpack.c.bf16 %v93_v45, %v92_v44  ;;  %v62_v53 = vld [vmem:[#allocation2 + $0x40] sm:$0xff]  ;;  %v80_v58 = vld [vmem:[#allocation2 + $0xd0] sm:$0xff] }
  0x33   :  { %1178 = vmatpush3.bf16.msra.mxu0 %v1177_v34  ;;  %v63_v54 = vld [vmem:[#allocation2 + $0x48] sm:$0xff]  ;;  %v94_v55 = vld [vmem:[#allocation2 + $0x140] sm:$0xff]  ;;  %v1215_v56 = vpack.c.bf16 %v111_v49, %v110_v48  ;;  %v81_v59 = vld [vmem:[#allocation2 + $0xd8] sm:$0xff] }
  0x34   :  { %1210 = vmatpush3.bf16.msra.mxu1 %v1209_v38  ;;  %1180 = vmatprep.subr.bf16.mxu0 %v1179_v39  ;;  %v95_v57 = vld [vmem:[#allocation2 + $0x148] sm:$0xff]  ;;  %v112_v60 = vld [vmem:[#allocation2 + $0x1d0] sm:$0xff]  ;;  %v113_v61 = vld [vmem:[#allocation2 + $0x1d8] sm:$0xff]  ;;  %v1185_v62 = vpack.c.bf16 %v63_v54, %v62_v53  ;;  %v1187_v0 = vpack.c.bf16 %v81_v59, %v80_v58 }
  0x35   :  { %1212 = vmatprep.subr.bf16.mxu1 %v1211_v43  ;;  %v1217_v63 = vpack.c.bf16 %v95_v57, %v94_v55  ;;  %v64_v1 = vld [vmem:[#allocation2 + $0x50] sm:$0xff]  ;;  %v65_v2 = vld [vmem:[#allocation2 + $0x58] sm:$0xff]  ;;  %v1219_v4 = vpack.c.bf16 %v113_v61, %v112_v60  ;;  %v82_v6 = vld [vmem:[#allocation2 + $0xe0] sm:$0xff] }
  0x36   :  { %v96_v3 = vld [vmem:[#allocation2 + $0x150] sm:$0xff]  ;;  %v97_v5 = vld [vmem:[#allocation2 + $0x158] sm:$0xff]  ;;  %v83_v7 = vld [vmem:[#allocation2 + $0xe8] sm:$0xff]  ;;  %v1189_v10 = vpack.c.bf16 %v65_v2, %v64_v1 }
  0x37   :  { %1182 = vmatpush3.bf16.msra.mxu0 %v1181_v50  ;;  %v114_v8 = vld [vmem:[#allocation2 + $0x1e0] sm:$0xff]  ;;  %v115_v9 = vld [vmem:[#allocation2 + $0x1e8] sm:$0xff]  ;;  %v1221_v13 = vpack.c.bf16 %v97_v5, %v96_v3  ;;  %v1191_v14 = vpack.c.bf16 %v83_v7, %v82_v6  ;;  %v41_v17 = vld [vmem:[#allocation5 + $0x18] sm:$0xff] }
  0x38   :  { %1214 = vmatpush3.bf16.msra.mxu1 %v1213_v51  ;;  %1184 = vmatprep.subr.bf16.mxu0 %v1183_v52  ;;  %v66_v11 = vld [vmem:[#allocation2 + $0x60] sm:$0xff]  ;;  %v67_v12 = vld [vmem:[#allocation2 + $0x68] sm:$0xff]  ;;  %v1223_v18 = vpack.c.bf16 %v115_v9, %v114_v8  ;;  %v84_v20 = vld [vmem:[#allocation2 + $0xf0] sm:$0xff] }
  0x39   :  { %1216 = vmatprep.subr.bf16.mxu1 %v1215_v56  ;;  %v98_v15 = vld [vmem:[#allocation2 + $0x160] sm:$0xff]  ;;  %v39_v16 = vld [vmem:[#allocation5 + $0x8] sm:$0xff]  ;;  %v85_v21 = vld [vmem:[#allocation2 + $0xf8] sm:$0xff]  ;;  %444 = vmatprep.mubr.f32.mxu1 %v41_v17  ;;  %v1193_v24 = vpack.c.bf16 %v67_v12, %v66_v11 }
  0x3a   :  { %v99_v19 = vld [vmem:[#allocation2 + $0x168] sm:$0xff]  ;;  %374 = vmatprep.mubr.f32.mxu0 %v39_v16  ;;  %v116_v22 = vld [vmem:[#allocation2 + $0x1f0] sm:$0xff]  ;;  %v117_v23 = vld [vmem:[#allocation2 + $0x1f8] sm:$0xff]  ;;  %v1195_v26 = vpack.c.bf16 %v85_v21, %v84_v20 }
  0x3b   :  { %1186 = vmatpush3.bf16.msra.mxu0 %v1185_v62  ;;  %v1225_v25 = vpack.c.bf16 %v99_v19, %v98_v15  ;;  %v68_v27 = vld [vmem:[#allocation2 + $0x70] sm:$0xff]  ;;  %v69_v28 = vld [vmem:[#allocation2 + $0x78] sm:$0xff]  ;;  %v1227_v30 = vpack.c.bf16 %v117_v23, %v116_v22  ;;  %v134_v32 = vld [vmem:[#allocation2 + $0x280] sm:$0xff] }
  0x3c   :  { %1218 = vmatpush3.bf16.msra.mxu1 %v1217_v63  ;;  %1188 = vmatprep.subr.bf16.mxu0 %v1187_v0  ;;  %v100_v29 = vld [vmem:[#allocation2 + $0x170] sm:$0xff]  ;;  %v101_v31 = vld [vmem:[#allocation2 + $0x178] sm:$0xff]  ;;  %v135_v33 = vld [vmem:[#allocation2 + $0x288] sm:$0xff]  ;;  %v1197_v36 = vpack.c.bf16 %v69_v28, %v68_v27 }
  0x3d   :  { %1220 = vmatprep.subr.bf16.mxu1 %v1219_v4  ;;  %v166_v34 = vld [vmem:[#allocation2 + $0x380] sm:$0xff]  ;;  %v167_v35 = vld [vmem:[#allocation2 + $0x388] sm:$0xff]  ;;  %v1229_v37 = vpack.c.bf16 %v101_v31, %v100_v29  ;;  %v1231_v38 = vpack.c.bf16 %v135_v33, %v134_v32  ;;  %v136_v44 = vld [vmem:[#allocation2 + $0x290] sm:$0xff] }
  0x3e   :  { %v118_v39 = vld [vmem:[#allocation2 + $0x200] sm:$0xff]  ;;  %v119_v40 = vld [vmem:[#allocation2 + $0x208] sm:$0xff]  ;;  %v1263_v42 = vpack.c.bf16 %v167_v35, %v166_v34  ;;  %v137_v45 = vld [vmem:[#allocation2 + $0x298] sm:$0xff] }
  0x3f   :  { %1190 = vmatpush3.bf16.msra.mxu0 %v1189_v10  ;;  %v150_v41 = vld [vmem:[#allocation2 + $0x300] sm:$0xff]  ;;  %v151_v43 = vld [vmem:[#allocation2 + $0x308] sm:$0xff]  ;;  %v168_v46 = vld [vmem:[#allocation2 + $0x390] sm:$0xff]  ;;  %v1233_v50 = vpack.c.bf16 %v119_v40, %v118_v39  ;;  %v1235_v52 = vpack.c.bf16 %v137_v45, %v136_v44 }
  0x40   :  { %1222 = vmatpush3.bf16.msra.mxu1 %v1221_v13  ;;  %1192 = vmatprep.subr.bf16.mxu0 %v1191_v14  ;;  %v169_v47 = vld [vmem:[#allocation2 + $0x398] sm:$0xff]  ;;  %v38_v48 = vld [vmem:[#allocation5] sm:$0xff]  ;;  %v40_v49 = vld [vmem:[#allocation5 + $0x10] sm:$0xff]  ;;  %v1265_v51 = vpack.c.bf16 %v151_v43, %v150_v41 }
  0x41   :  { %1224 = vmatprep.subr.bf16.mxu1 %v1223_v18  ;;  %v120_v53 = vld [vmem:[#allocation2 + $0x210] sm:$0xff]  ;;  %v121_v54 = vld [vmem:[#allocation2 + $0x218] sm:$0xff]  ;;  %v1267_v56 = vpack.c.bf16 %v169_v47, %v168_v46  ;;  %v138_v58 = vld [vmem:[#allocation2 + $0x2a0] sm:$0xff] }
  0x42   :  { %v152_v55 = vld [vmem:[#allocation2 + $0x310] sm:$0xff]  ;;  %v153_v57 = vld [vmem:[#allocation2 + $0x318] sm:$0xff]  ;;  %v139_v59 = vld [vmem:[#allocation2 + $0x2a8] sm:$0xff]  ;;  %v1237_v62 = vpack.c.bf16 %v121_v54, %v120_v53 }
  0x43   :  { %1194 = vmatpush3.bf16.msra.mxu0 %v1193_v24  ;;  %v170_v60 = vld [vmem:[#allocation2 + $0x3a0] sm:$0xff]  ;;  %v171_v61 = vld [vmem:[#allocation2 + $0x3a8] sm:$0xff]  ;;  %v1269_v63 = vpack.c.bf16 %v153_v57, %v152_v55  ;;  %v1239_v0 = vpack.c.bf16 %v139_v59, %v138_v58  ;;  %v140_v6 = vld [vmem:[#allocation2 + $0x2b0] sm:$0xff] }
  0x44   :  { %1226 = vmatpush3.bf16.msra.mxu1 %v1225_v25  ;;  %1196 = vmatprep.subr.bf16.mxu0 %v1195_v26  ;;  %v122_v1 = vld [vmem:[#allocation2 + $0x220] sm:$0xff]  ;;  %v123_v2 = vld [vmem:[#allocation2 + $0x228] sm:$0xff]  ;;  %v1271_v4 = vpack.c.bf16 %v171_v61, %v170_v60  ;;  %v141_v7 = vld [vmem:[#allocation2 + $0x2b8] sm:$0xff] }
  0x45   :  { %1228 = vmatprep.subr.bf16.mxu1 %v1227_v30  ;;  %v154_v3 = vld [vmem:[#allocation2 + $0x320] sm:$0xff]  ;;  %v155_v5 = vld [vmem:[#allocation2 + $0x328] sm:$0xff]  ;;  %v172_v8 = vld [vmem:[#allocation2 + $0x3b0] sm:$0xff]  ;;  %v1241_v10 = vpack.c.bf16 %v123_v2, %v122_v1  ;;  %v1243_v12 = vpack.c.bf16 %v141_v7, %v140_v6 }
  0x46   :  { %v173_v9 = vld [vmem:[#allocation2 + $0x3b8] sm:$0xff]  ;;  %v1273_v11 = vpack.c.bf16 %v155_v5, %v154_v3  ;;  %v124_v13 = vld [vmem:[#allocation2 + $0x230] sm:$0xff]  ;;  %v142_v18 = vld [vmem:[#allocation2 + $0x2c0] sm:$0xff] }
  0x47   :  { %1198 = vmatpush3.bf16.msra.mxu0 %v1197_v36  ;;  %v125_v14 = vld [vmem:[#allocation2 + $0x238] sm:$0xff]  ;;  %v156_v15 = vld [vmem:[#allocation2 + $0x330] sm:$0xff]  ;;  %v1275_v16 = vpack.c.bf16 %v173_v9, %v172_v8  ;;  %v143_v19 = vld [vmem:[#allocation2 + $0x2c8] sm:$0xff] }
  0x48   :  { %1230 = vmatpush3.bf16.msra.mxu1 %v1229_v37  ;;  %1232 = vmatprep.subr.bf16.mxu0 %v1231_v38  ;;  %v157_v17 = vld [vmem:[#allocation2 + $0x338] sm:$0xff]  ;;  %v174_v20 = vld [vmem:[#allocation2 + $0x3c0] sm:$0xff]  ;;  %v175_v21 = vld [vmem:[#allocation2 + $0x3c8] sm:$0xff]  ;;  %v1245_v22 = vpack.c.bf16 %v125_v14, %v124_v13  ;;  %v1247_v26 = vpack.c.bf16 %v143_v19, %v142_v18 }
  0x49   :  { %1264 = vmatprep.subr.bf16.mxu1 %v1263_v42  ;;  %v126_v23 = vld [vmem:[#allocation2 + $0x240] sm:$0xff]  ;;  %v43_v24 = vld [vmem:[#allocation5 + $0x28] sm:$0xff]  ;;  %v1277_v25 = vpack.c.bf16 %v157_v17, %v156_v15  ;;  %v45_v29 = vld [vmem:[#allocation5 + $0x38] sm:$0xff]  ;;  %v1279_v30 = vpack.c.bf16 %v175_v21, %v174_v20 }
  0x4a   :  { %375 = vmatmul.mubr.f32.vlgmr.msra.gmra.mrb[0].mxu0 %v38_v48  ;;  %v127_v27 = vld [vmem:[#allocation2 + $0x248] sm:$0xff]  ;;  %v158_v28 = vld [vmem:[#allocation2 + $0x340] sm:$0xff]  ;;  %v144_v32 = vld [vmem:[#allocation2 + $0x2d0] sm:$0xff] }
  0x4b   :  { %445 = vmatmul.mubr.f32.vlgmr.msra.gmra.mrb[0].mxu1 %v40_v49  ;;  %1234 = vmatpush3.bf16.msra.mxu0 %v1233_v50  ;;  %v159_v31 = vld [vmem:[#allocation2 + $0x348] sm:$0xff]  ;;  %v145_v33 = vld [vmem:[#allocation2 + $0x2d8] sm:$0xff]  ;;  %v176_v34 = vld [vmem:[#allocation2 + $0x3d0] sm:$0xff]  ;;  %v1249_v36 = vpack.c.bf16 %v127_v27, %v126_v23 }
  0x4c   :  { %1266 = vmatpush3.bf16.msra.mxu1 %v1265_v51  ;;  %1236 = vmatprep.subr.bf16.mxu0 %v1235_v52  ;;  %v177_v35 = vld [vmem:[#allocation2 + $0x3d8] sm:$0xff]  ;;  %v1281_v37 = vpack.c.bf16 %v159_v31, %v158_v28  ;;  %v1251_v38 = vpack.c.bf16 %v145_v33, %v144_v32  ;;  %v128_v39 = vld [vmem:[#allocation2 + $0x250] sm:$0xff]  ;;  %v146_v44 = vld [vmem:[#allocation2 + $0x2e0] sm:$0xff] }
  0x4d   :  { %1268 = vmatprep.subr.bf16.mxu1 %v1267_v56  ;;  %514 = vmatprep.mubr.f32.mxu0 %v43_v24  ;;  %v129_v40 = vld [vmem:[#allocation2 + $0x258] sm:$0xff]  ;;  %v160_v41 = vld [vmem:[#allocation2 + $0x350] sm:$0xff]  ;;  %v1283_v42 = vpack.c.bf16 %v177_v35, %v176_v34  ;;  %v147_v45 = vld [vmem:[#allocation2 + $0x2e8] sm:$0xff] }
  0x4e   :  { %584 = vmatprep.mubr.f32.mxu1 %v45_v29  ;;  %v161_v43 = vld [vmem:[#allocation2 + $0x358] sm:$0xff]  ;;  %v178_v46 = vld [vmem:[#allocation2 + $0x3e0] sm:$0xff]  ;;  %v179_v47 = vld [vmem:[#allocation2 + $0x3e8] sm:$0xff]  ;;  %v1253_v48 = vpack.c.bf16 %v129_v40, %v128_v39  ;;  %v1255_v50 = vpack.c.bf16 %v147_v45, %v146_v44 }
  0x4f   :  { %1238 = vmatpush3.bf16.msra.mxu0 %v1237_v62  ;;  %v1285_v49 = vpack.c.bf16 %v161_v43, %v160_v41  ;;  %v130_v51 = vld [vmem:[#allocation2 + $0x260] sm:$0xff]  ;;  %v131_v52 = vld [vmem:[#allocation2 + $0x268] sm:$0xff]  ;;  %v1287_v54 = vpack.c.bf16 %v179_v47, %v178_v46  ;;  %v148_v56 = vld [vmem:[#allocation2 + $0x2f0] sm:$0xff] }
  0x50   :  { %1270 = vmatpush3.bf16.msra.mxu1 %v1269_v63  ;;  %1240 = vmatprep.subr.bf16.mxu0 %v1239_v0  ;;  %v162_v53 = vld [vmem:[#allocation2 + $0x360] sm:$0xff]  ;;  %v163_v55 = vld [vmem:[#allocation2 + $0x368] sm:$0xff]  ;;  %v149_v57 = vld [vmem:[#allocation2 + $0x2f8] sm:$0xff]  ;;  %v1257_v60 = vpack.c.bf16 %v131_v52, %v130_v51 }
  0x51   :  { %1272 = vmatprep.subr.bf16.mxu1 %v1271_v4  ;;  %v180_v58 = vld [vmem:[#allocation2 + $0x3f0] sm:$0xff]  ;;  %v181_v59 = vld [vmem:[#allocation2 + $0x3f8] sm:$0xff]  ;;  %v1289_v61 = vpack.c.bf16 %v163_v55, %v162_v53  ;;  %v1259_v62 = vpack.c.bf16 %v149_v57, %v148_v56  ;;  %v198_v4 = vld [vmem:[#allocation2 + $0x480] sm:$0xff] }
  0x52   :  { %v132_v63 = vld [vmem:[#allocation2 + $0x270] sm:$0xff]  ;;  %v133_v0 = vld [vmem:[#allocation2 + $0x278] sm:$0xff]  ;;  %v1291_v2 = vpack.c.bf16 %v181_v59, %v180_v58  ;;  %v199_v5 = vld [vmem:[#allocation2 + $0x488] sm:$0xff] }
  0x53   :  { %1242 = vmatpush3.bf16.msra.mxu0 %v1241_v10  ;;  %v164_v1 = vld [vmem:[#allocation2 + $0x370] sm:$0xff]  ;;  %v165_v3 = vld [vmem:[#allocation2 + $0x378] sm:$0xff]  ;;  %v230_v6 = vld [vmem:[#allocation2 + $0x580] sm:$0xff]  ;;  %v1261_v8 = vpack.c.bf16 %v133_v0, %v132_v63  ;;  %v1295_v10 = vpack.c.bf16 %v199_v5, %v198_v4 }
  0x54   :  { %1274 = vmatpush3.bf16.msra.mxu1 %v1273_v11  ;;  %1244 = vmatprep.subr.bf16.mxu0 %v1243_v12  ;;  %v231_v7 = vld [vmem:[#allocation2 + $0x588] sm:$0xff]  ;;  %v1293_v9 = vpack.c.bf16 %v165_v3, %v164_v1  ;;  %v182_v11 = vld [vmem:[#allocation2 + $0x400] sm:$0xff]  ;;  %v201_v17 = vld [vmem:[#allocation2 + $0x498] sm:$0xff] }
  0x55   :  { %1276 = vmatprep.subr.bf16.mxu1 %v1275_v16  ;;  %v183_v12 = vld [vmem:[#allocation2 + $0x408] sm:$0xff]  ;;  %v214_v13 = vld [vmem:[#allocation2 + $0x500] sm:$0xff]  ;;  %v1327_v14 = vpack.c.bf16 %v231_v7, %v230_v6  ;;  %v200_v16 = vld [vmem:[#allocation2 + $0x490] sm:$0xff] }
  0x56   :  { %v215_v15 = vld [vmem:[#allocation2 + $0x508] sm:$0xff]  ;;  %v232_v18 = vld [vmem:[#allocation2 + $0x590] sm:$0xff]  ;;  %v233_v19 = vld [vmem:[#allocation2 + $0x598] sm:$0xff]  ;;  %v1297_v21 = vpack.c.bf16 %v183_v12, %v182_v11  ;;  %v1299_v24 = vpack.c.bf16 %v201_v17, %v200_v16 }
  0x57   :  { %1246 = vmatpush3.bf16.msra.mxu0 %v1245_v22  ;;  %v42_v20 = vld [vmem:[#allocation5 + $0x20] sm:$0xff]  ;;  %v44_v22 = vld [vmem:[#allocation5 + $0x30] sm:$0xff]  ;;  %v1329_v23 = vpack.c.bf16 %v215_v15, %v214_v13  ;;  %v1331_v28 = vpack.c.bf16 %v233_v19, %v232_v18  ;;  %v217_v29 = vld [vmem:[#allocation2 + $0x518] sm:$0xff] }
  0x58   :  { %1278 = vmatpush3.bf16.msra.mxu1 %v1277_v25  ;;  %1248 = vmatprep.subr.bf16.mxu0 %v1247_v26  ;;  %v184_v25 = vld [vmem:[#allocation2 + $0x410] sm:$0xff]  ;;  %v185_v26 = vld [vmem:[#allocation2 + $0x418] sm:$0xff]  ;;  %v203_v31 = vld [vmem:[#allocation2 + $0x4a8] sm:$0xff] }
  0x59   :  { %1280 = vmatprep.subr.bf16.mxu1 %v1279_v30  ;;  %v216_v27 = vld [vmem:[#allocation2 + $0x510] sm:$0xff]  ;;  %v202_v30 = vld [vmem:[#allocation2 + $0x4a0] sm:$0xff]  ;;  %v235_v33 = vld [vmem:[#allocation2 + $0x5a8] sm:$0xff]  ;;  %v1301_v35 = vpack.c.bf16 %v185_v26, %v184_v25 }
  0x5a   :  { %v234_v32 = vld [vmem:[#allocation2 + $0x5a0] sm:$0xff]  ;;  %v47_v34 = vld [vmem:[#allocation5 + $0x48] sm:$0xff]  ;;  %v204_v44 = vld [vmem:[#allocation2 + $0x4b0] sm:$0xff] }
  0x5b   :  { %1250 = vmatpush3.bf16.msra.mxu0 %v1249_v36  ;;  %v49_v36 = vld [vmem:[#allocation5 + $0x58] sm:$0xff]  ;;  %v186_v39 = vld [vmem:[#allocation2 + $0x420] sm:$0xff]  ;;  %v187_v40 = vld [vmem:[#allocation2 + $0x428] sm:$0xff] }
  0x5c   :  { %1282 = vmatpush3.bf16.msra.mxu1 %v1281_v37  ;;  %1252 = vmatprep.subr.bf16.mxu0 %v1251_v38  ;;  %v1333_v37 = vpack.c.bf16 %v217_v29, %v216_v27  ;;  %v1303_v38 = vpack.c.bf16 %v203_v31, %v202_v30  ;;  %v218_v41 = vld [vmem:[#allocation2 + $0x520] sm:$0xff]  ;;  %v219_v43 = vld [vmem:[#allocation2 + $0x528] sm:$0xff]  ;;  %v205_v45 = vld [vmem:[#allocation2 + $0x4b8] sm:$0xff] }
  0x5d   :  { %1284 = vmatprep.subr.bf16.mxu1 %v1283_v42  ;;  %v1335_v42 = vpack.c.bf16 %v235_v33, %v234_v32  ;;  %v236_v46 = vld [vmem:[#allocation2 + $0x5b0] sm:$0xff]  ;;  %v237_v47 = vld [vmem:[#allocation2 + $0x5b8] sm:$0xff]  ;;  %v206_v56 = vld [vmem:[#allocation2 + $0x4c0] sm:$0xff] }
  0x5e   :  { %v188_v51 = vld [vmem:[#allocation2 + $0x430] sm:$0xff]  ;;  %v189_v52 = vld [vmem:[#allocation2 + $0x438] sm:$0xff]  ;;  %v207_v57 = vld [vmem:[#allocation2 + $0x4c8] sm:$0xff] }
  0x5f   :  { %1254 = vmatpush3.bf16.msra.mxu0 %v1253_v48  ;;  %v1305_v48 = vpack.c.bf16 %v187_v40, %v186_v39  ;;  %v220_v53 = vld [vmem:[#allocation2 + $0x530] sm:$0xff]  ;;  %v221_v55 = vld [vmem:[#allocation2 + $0x538] sm:$0xff]  ;;  %v238_v58 = vld [vmem:[#allocation2 + $0x5c0] sm:$0xff] }
  0x60   :  { %1286 = vmatpush3.bf16.msra.mxu1 %v1285_v49  ;;  %1256 = vmatprep.subr.bf16.mxu0 %v1255_v50  ;;  %v1337_v49 = vpack.c.bf16 %v219_v43, %v218_v41  ;;  %v1307_v50 = vpack.c.bf16 %v205_v45, %v204_v44  ;;  %v239_v59 = vld [vmem:[#allocation2 + $0x5c8] sm:$0xff]  ;;  %v190_v63 = vld [vmem:[#allocation2 + $0x440] sm:$0xff]  ;;  %v208_v4 = vld [vmem:[#allocation2 + $0x4d0] sm:$0xff] }
  0x61   :  { %1288 = vmatprep.subr.bf16.mxu1 %v1287_v54  ;;  %v1339_v54 = vpack.c.bf16 %v237_v47, %v236_v46  ;;  %v191_v0 = vld [vmem:[#allocation2 + $0x448] sm:$0xff]  ;;  %v222_v1 = vld [vmem:[#allocation2 + $0x540] sm:$0xff]  ;;  %v209_v5 = vld [vmem:[#allocation2 + $0x4d8] sm:$0xff] }
  0x62   :  { %v223_v3 = vld [vmem:[#allocation2 + $0x548] sm:$0xff]  ;;  %v240_v6 = vld [vmem:[#allocation2 + $0x5d0] sm:$0xff]  ;;  %v241_v7 = vld [vmem:[#allocation2 + $0x5d8] sm:$0xff] }
  0x63   :  { %1258 = vmatpush3.bf16.msra.mxu0 %v1257_v60  ;;  %v1309_v60 = vpack.c.bf16 %v189_v52, %v188_v51  ;;  %v192_v11 = vld [vmem:[#allocation2 + $0x450] sm:$0xff]  ;;  %v193_v12 = vld [vmem:[#allocation2 + $0x458] sm:$0xff]  ;;  %v210_v16 = vld [vmem:[#allocation2 + $0x4e0] sm:$0xff] }
  0x64   :  { %1290 = vmatpush3.bf16.msra.mxu1 %v1289_v61  ;;  %1260 = vmatprep.subr.bf16.mxu0 %v1259_v62  ;;  %v1341_v61 = vpack.c.bf16 %v221_v55, %v220_v53  ;;  %v1311_v62 = vpack.c.bf16 %v207_v57, %v206_v56  ;;  %v224_v13 = vld [vmem:[#allocation2 + $0x550] sm:$0xff]  ;;  %v225_v15 = vld [vmem:[#allocation2 + $0x558] sm:$0xff]  ;;  %v211_v17 = vld [vmem:[#allocation2 + $0x4e8] sm:$0xff] }
  0x65   :  { %1292 = vmatprep.subr.bf16.mxu1 %v1291_v2  ;;  %v1343_v2 = vpack.c.bf16 %v239_v59, %v238_v58  ;;  %v242_v18 = vld [vmem:[#allocation2 + $0x5e0] sm:$0xff]  ;;  %v243_v19 = vld [vmem:[#allocation2 + $0x5e8] sm:$0xff]  ;;  %v213_v29 = vld [vmem:[#allocation2 + $0x4f8] sm:$0xff] }
  0x66   :  { %v226_v25 = vld [vmem:[#allocation2 + $0x560] sm:$0xff]  ;;  %v1351_v26 = vpack.c.bf16 %v243_v19, %v242_v18  ;;  %v227_v27 = vld [vmem:[#allocation2 + $0x568] sm:$0xff]  ;;  %v244_v30 = vld [vmem:[#allocation2 + $0x5f0] sm:$0xff] }
  0x67   :  { %1262 = vmatpush3.bf16.msra.mxu0 %v1261_v8  ;;  %v1313_v8 = vpack.c.bf16 %v191_v0, %v190_v63  ;;  %v245_v31 = vld [vmem:[#allocation2 + $0x5f8] sm:$0xff]  ;;  %v1353_v33 = vpack.c.bf16 %v227_v27, %v226_v25  ;;  %v262_v40 = vld [vmem:[#allocation2 + $0x680] sm:$0xff]  ;;  %v263_v41 = vld [vmem:[#allocation2 + $0x688] sm:$0xff] }
  0x68   :  { %1294 = vmatpush3.bf16.msra.mxu1 %v1293_v9  ;;  %1296 = vmatprep.subr.bf16.mxu0 %v1295_v10  ;;  %v1345_v9 = vpack.c.bf16 %v223_v3, %v222_v1  ;;  %v1315_v10 = vpack.c.bf16 %v209_v5, %v208_v4  ;;  %v229_v39 = vld [vmem:[#allocation2 + $0x578] sm:$0xff]  ;;  %v295_v43 = vld [vmem:[#allocation2 + $0x788] sm:$0xff]  ;;  %v1359_v46 = vpack.c.bf16 %v263_v41, %v262_v40  ;;  %v246_v47 = vld [vmem:[#allocation2 + $0x600] sm:$0xff] }
  0x69   :  { %1328 = vmatprep.subr.bf16.mxu1 %v1327_v14  ;;  %v1347_v14 = vpack.c.bf16 %v241_v7, %v240_v6  ;;  %v279_v51 = vld [vmem:[#allocation2 + $0x708] sm:$0xff]  ;;  %v264_v52 = vld [vmem:[#allocation2 + $0x690] sm:$0xff]  ;;  %v265_v53 = vld [vmem:[#allocation2 + $0x698] sm:$0xff] }
  0x6a   :  { %515 = vmatmul.mubr.f32.vlgmr.msra.gmra.mrb[2].mxu0 %v42_v20  ;;  %v1317_v20 = vpack.c.bf16 %v193_v12, %v192_v11  ;;  %v297_v55 = vld [vmem:[#allocation2 + $0x798] sm:$0xff]  ;;  %v46_v56 = vld [vmem:[#allocation5 + $0x40] sm:$0xff]  ;;  %v48_v58 = vld [vmem:[#allocation5 + $0x50] sm:$0xff] }
  0x6b   :  { %1298 = vmatpush3.bf16.msra.mxu0 %v1297_v21  ;;  %585 = vmatmul.mubr.f32.vlgmr.msra.gmra.mrb[2].mxu1 %v44_v22  ;;  %v1349_v21 = vpack.c.bf16 %v225_v15, %v224_v13  ;;  %v1319_v22 = vpack.c.bf16 %v211_v17, %v210_v16  ;;  %v280_v63 = vld [vmem:[#allocation2 + $0x710] sm:$0xff]  ;;  %v281_v1 = vld [vmem:[#allocation2 + $0x718] sm:$0xff]  ;;  %v267_v3 = vld [vmem:[#allocation2 + $0x6a8] sm:$0xff] }
  0x6c   :  { %1330 = vmatpush3.bf16.msra.mxu1 %v1329_v23  ;;  %1300 = vmatprep.subr.bf16.mxu0 %v1299_v24  ;;  %v194_v23 = vld [vmem:[#allocation2 + $0x460] sm:$0xff]  ;;  %v195_v24 = vld [vmem:[#allocation2 + $0x468] sm:$0xff]  ;;  %v268_v16 = vld [vmem:[#allocation2 + $0x6b0] sm:$0xff] }
  0x6d   :  { %1332 = vmatprep.subr.bf16.mxu1 %v1331_v28  ;;  %654 = vmatprep.mubr.f32.mxu0 %v47_v34  ;;  %v212_v28 = vld [vmem:[#allocation2 + $0x4f0] sm:$0xff]  ;;  %v1321_v32 = vpack.c.bf16 %v195_v24, %v194_v23  ;;  %v298_v4 = vld [vmem:[#allocation2 + $0x7a0] sm:$0xff]  ;;  %v299_v5 = vld [vmem:[#allocation2 + $0x7a8] sm:$0xff] }
  0x6e   :  { %724 = vmatprep.mubr.f32.mxu1 %v49_v36  ;;  %v1323_v34 = vpack.c.bf16 %v213_v29, %v212_v28  ;;  %v197_v36 = vld [vmem:[#allocation2 + $0x478] sm:$0xff]  ;;  %v51_v6 = vld [vmem:[#allocation5 + $0x68] sm:$0xff]  ;;  %v250_v11 = vld [vmem:[#allocation2 + $0x620] sm:$0xff] }
  0x6f   :  { %1302 = vmatpush3.bf16.msra.mxu0 %v1301_v35  ;;  %v196_v35 = vld [vmem:[#allocation2 + $0x470] sm:$0xff]  ;;  %v251_v12 = vld [vmem:[#allocation2 + $0x628] sm:$0xff]  ;;  %v282_v13 = vld [vmem:[#allocation2 + $0x720] sm:$0xff] }
  0x70   :  { %1334 = vmatpush3.bf16.msra.mxu1 %v1333_v37  ;;  %1304 = vmatprep.subr.bf16.mxu0 %v1303_v38  ;;  %v228_v37 = vld [vmem:[#allocation2 + $0x570] sm:$0xff]  ;;  %v1355_v38 = vpack.c.bf16 %v245_v31, %v244_v30  ;;  %v1325_v44 = vpack.c.bf16 %v197_v36, %v196_v35  ;;  %v283_v15 = vld [vmem:[#allocation2 + $0x728] sm:$0xff]  ;;  %v269_v17 = vld [vmem:[#allocation2 + $0x6b8] sm:$0xff] }
  0x71   :  { %1336 = vmatprep.subr.bf16.mxu1 %v1335_v42  ;;  %v294_v42 = vld [vmem:[#allocation2 + $0x780] sm:$0xff]  ;;  %v1357_v45 = vpack.c.bf16 %v229_v39, %v228_v37  ;;  %v300_v18 = vld [vmem:[#allocation2 + $0x7b0] sm:$0xff]  ;;  %v301_v19 = vld [vmem:[#allocation2 + $0x7b8] sm:$0xff] }
  0x72   :  { %v252_v23 = vld [vmem:[#allocation2 + $0x630] sm:$0xff]  ;;  %v253_v24 = vld [vmem:[#allocation2 + $0x638] sm:$0xff]  ;;  %v270_v28 = vld [vmem:[#allocation2 + $0x6c0] sm:$0xff] }
  0x73   :  { %1306 = vmatpush3.bf16.msra.mxu0 %v1305_v48  ;;  %v247_v48 = vld [vmem:[#allocation2 + $0x608] sm:$0xff]  ;;  %v284_v25 = vld [vmem:[#allocation2 + $0x730] sm:$0xff]  ;;  %v285_v27 = vld [vmem:[#allocation2 + $0x738] sm:$0xff] }
  0x74   :  { %1338 = vmatpush3.bf16.msra.mxu1 %v1337_v49  ;;  %1308 = vmatprep.subr.bf16.mxu0 %v1307_v50  ;;  %v278_v49 = vld [vmem:[#allocation2 + $0x700] sm:$0xff]  ;;  %v1391_v50 = vpack.c.bf16 %v295_v43, %v294_v42  ;;  %v1361_v57 = vpack.c.bf16 %v247_v48, %v246_v47  ;;  %v271_v29 = vld [vmem:[#allocation2 + $0x6c8] sm:$0xff]  ;;  %v272_v40 = vld [vmem:[#allocation2 + $0x6d0] sm:$0xff] }
  0x75   :  { %1340 = vmatprep.subr.bf16.mxu1 %v1339_v54  ;;  %v296_v54 = vld [vmem:[#allocation2 + $0x790] sm:$0xff]  ;;  %v1393_v59 = vpack.c.bf16 %v279_v51, %v278_v49  ;;  %v302_v30 = vld [vmem:[#allocation2 + $0x7c0] sm:$0xff]  ;;  %v303_v31 = vld [vmem:[#allocation2 + $0x7c8] sm:$0xff] }
  0x76   :  { %v1395_v0 = vpack.c.bf16 %v297_v55, %v296_v54  ;;  %v254_v35 = vld [vmem:[#allocation2 + $0x640] sm:$0xff]  ;;  %v255_v36 = vld [vmem:[#allocation2 + $0x648] sm:$0xff]  ;;  %v273_v41 = vld [vmem:[#allocation2 + $0x6d8] sm:$0xff] }
  0x77   :  { %1310 = vmatpush3.bf16.msra.mxu0 %v1309_v60  ;;  %v1363_v60 = vpack.c.bf16 %v265_v53, %v264_v52  ;;  %v286_v37 = vld [vmem:[#allocation2 + $0x740] sm:$0xff]  ;;  %v287_v39 = vld [vmem:[#allocation2 + $0x748] sm:$0xff]  ;;  %v304_v42 = vld [vmem:[#allocation2 + $0x7d0] sm:$0xff] }
  0x78   :  { %1342 = vmatpush3.bf16.msra.mxu1 %v1341_v61  ;;  %1312 = vmatprep.subr.bf16.mxu0 %v1311_v62  ;;  %v248_v61 = vld [vmem:[#allocation2 + $0x610] sm:$0xff]  ;;  %v249_v62 = vld [vmem:[#allocation2 + $0x618] sm:$0xff]  ;;  %v274_v52 = vld [vmem:[#allocation2 + $0x6e0] sm:$0xff] }
  0x79   :  { %1344 = vmatprep.subr.bf16.mxu1 %v1343_v2  ;;  %v266_v2 = vld [vmem:[#allocation2 + $0x6a0] sm:$0xff]  ;;  %v1365_v7 = vpack.c.bf16 %v249_v62, %v248_v61  ;;  %v305_v43 = vld [vmem:[#allocation2 + $0x7d8] sm:$0xff]  ;;  %v256_v47 = vld [vmem:[#allocation2 + $0x650] sm:$0xff] }
  0x7a   :  { %v257_v48 = vld [vmem:[#allocation2 + $0x658] sm:$0xff]  ;;  %v288_v49 = vld [vmem:[#allocation2 + $0x750] sm:$0xff]  ;;  %v275_v53 = vld [vmem:[#allocation2 + $0x6e8] sm:$0xff] }
  0x7b   :  { %1314 = vmatpush3.bf16.msra.mxu0 %v1313_v8  ;;  %v53_v8 = vld [vmem:[#allocation5 + $0x78] sm:$0xff]  ;;  %v306_v54 = vld [vmem:[#allocation2 + $0x7e0] sm:$0xff]  ;;  %v307_v55 = vld [vmem:[#allocation2 + $0x7e8] sm:$0xff] }
  0x7c   :  { %1346 = vmatpush3.bf16.msra.mxu1 %v1345_v9  ;;  %1316 = vmatprep.subr.bf16.mxu0 %v1315_v10  ;;  %v1397_v9 = vpack.c.bf16 %v281_v1, %v280_v63  ;;  %v1367_v10 = vpack.c.bf16 %v267_v3, %v266_v2  ;;  %v289_v51 = vld [vmem:[#allocation2 + $0x758] sm:$0xff]  ;;  %v290_v61 = vld [vmem:[#allocation2 + $0x760] sm:$0xff]  ;;  %v1415_v62 = vpack.c.bf16 %v307_v55, %v306_v54  ;;  %v291_v63 = vld [vmem:[#allocation2 + $0x768] sm:$0xff] }
  0x7d   :  { %1348 = vmatprep.subr.bf16.mxu1 %v1347_v14  ;;  %v1399_v14 = vpack.c.bf16 %v299_v5, %v298_v4  ;;  %v277_v1 = vld [vmem:[#allocation2 + $0x6f8] sm:$0xff]  ;;  %v308_v2 = vld [vmem:[#allocation2 + $0x7f0] sm:$0xff]  ;;  %v1417_v5 = vpack.c.bf16 %v291_v63, %v290_v61 }
  0x7e   :  { %v309_v3 = vld [vmem:[#allocation2 + $0x7f8] sm:$0xff] }
  0x7f   :  { %1318 = vmatpush3.bf16.msra.mxu0 %v1317_v20  ;;  %v1369_v20 = vpack.c.bf16 %v251_v12, %v250_v11  ;;  %v293_v11 = vld [vmem:[#allocation2 + $0x778] sm:$0xff] }
  0x80   :  { %1350 = vmatpush3.bf16.msra.mxu1 %v1349_v21  ;;  %1320 = vmatprep.subr.bf16.mxu0 %v1319_v22  ;;  %v1401_v21 = vpack.c.bf16 %v283_v15, %v282_v13  ;;  %v1371_v22 = vpack.c.bf16 %v269_v17, %v268_v16  ;;  %v52_v15 = vld [vmem:[#allocation5 + $0x70] sm:$0xff] }
  0x81   :  { %1352 = vmatprep.subr.bf16.mxu1 %v1351_v26  ;;  %v1403_v26 = vpack.c.bf16 %v301_v19, %v300_v18 }
  0x83   :  { %1322 = vmatpush3.bf16.msra.mxu0 %v1321_v32  ;;  %v1373_v32 = vpack.c.bf16 %v253_v24, %v252_v23 }
  0x84   :  { %1354 = vmatpush3.bf16.msra.mxu1 %v1353_v33  ;;  %1324 = vmatprep.subr.bf16.mxu0 %v1323_v34  ;;  %v1405_v33 = vpack.c.bf16 %v285_v27, %v284_v25  ;;  %v1375_v34 = vpack.c.bf16 %v271_v29, %v270_v28 }
  0x85   :  { %1356 = vmatprep.subr.bf16.mxu1 %v1355_v38  ;;  %v1407_v38 = vpack.c.bf16 %v303_v31, %v302_v30 }
  0x87   :  { %1326 = vmatpush3.bf16.msra.mxu0 %v1325_v44  ;;  %v1377_v44 = vpack.c.bf16 %v255_v36, %v254_v35 }
  0x88   :  { %1358 = vmatpush3.bf16.msra.mxu1 %v1357_v45  ;;  %1360 = vmatprep.subr.bf16.mxu0 %v1359_v46  ;;  %v1409_v45 = vpack.c.bf16 %v287_v39, %v286_v37  ;;  %v1379_v46 = vpack.c.bf16 %v273_v41, %v272_v40 }
  0x89   :  { %1392 = vmatprep.subr.bf16.mxu1 %v1391_v50  ;;  %v1411_v50 = vpack.c.bf16 %v305_v43, %v304_v42 }
  0x8a   :  { %655 = vmatmul.mubr.f32.vlgmr.msra.gmra.mrb[4].mxu0 %v46_v56  ;;  %v1381_v56 = vpack.c.bf16 %v257_v48, %v256_v47 }
  0x8b   :  { %1362 = vmatpush3.bf16.msra.mxu0 %v1361_v57  ;;  %725 = vmatmul.mubr.f32.vlgmr.msra.gmra.mrb[4].mxu1 %v48_v58  ;;  %v1413_v57 = vpack.c.bf16 %v289_v51, %v288_v49  ;;  %v1383_v58 = vpack.c.bf16 %v275_v53, %v274_v52 }
  0x8c   :  { %1394 = vmatpush3.bf16.msra.mxu1 %v1393_v59  ;;  %1364 = vmatprep.subr.bf16.mxu0 %v1363_v60  ;;  %v258_v59 = vld [vmem:[#allocation2 + $0x660] sm:$0xff]  ;;  %v259_v60 = vld [vmem:[#allocation2 + $0x668] sm:$0xff] }
  0x8d   :  { %1396 = vmatprep.subr.bf16.mxu1 %v1395_v0  ;;  %794 = vmatprep.mubr.f32.mxu0 %v51_v6  ;;  %v276_v0 = vld [vmem:[#allocation2 + $0x6f0] sm:$0xff]  ;;  %v1385_v4 = vpack.c.bf16 %v259_v60, %v258_v59 }
  0x8e   :  { %864 = vmatprep.mubr.f32.mxu1 %v53_v8  ;;  %v1387_v6 = vpack.c.bf16 %v277_v1, %v276_v0  ;;  %v261_v8 = vld [vmem:[#allocation2 + $0x678] sm:$0xff] }
  0x8f   :  { %1366 = vmatpush3.bf16.msra.mxu0 %v1365_v7  ;;  %v260_v7 = vld [vmem:[#allocation2 + $0x670] sm:$0xff] }
  0x90   :  { %1398 = vmatpush3.bf16.msra.mxu1 %v1397_v9  ;;  %1368 = vmatprep.subr.bf16.mxu0 %v1367_v10  ;;  %v1419_v9 = vpack.c.bf16 %v309_v3, %v308_v2  ;;  %v292_v10 = vld [vmem:[#allocation2 + $0x770] sm:$0xff]  ;;  %v1389_v12 = vpack.c.bf16 %v261_v8, %v260_v7 }
  0x91   :  { %1400 = vmatprep.subr.bf16.mxu1 %v1399_v14  ;;  %v1421_v13 = vpack.c.bf16 %v293_v11, %v292_v10  ;;  %v50_v14 = vld [vmem:[#allocation5 + $0x60] sm:$0xff] }
  0x93   :  { %1370 = vmatpush3.bf16.msra.mxu0 %v1369_v20 }
  0x94   :  { %1402 = vmatpush3.bf16.msra.mxu1 %v1401_v21  ;;  %1372 = vmatprep.subr.bf16.mxu0 %v1371_v22 }
  0x95   :  { %1404 = vmatprep.subr.bf16.mxu1 %v1403_v26 }
  0x97   :  { %1374 = vmatpush3.bf16.msra.mxu0 %v1373_v32 }
  0x98   :  { %1406 = vmatpush3.bf16.msra.mxu1 %v1405_v33  ;;  %1376 = vmatprep.subr.bf16.mxu0 %v1375_v34 }
  0x99   :  { %1408 = vmatprep.subr.bf16.mxu1 %v1407_v38 }
  0x9b   :  { %1378 = vmatpush3.bf16.msra.mxu0 %v1377_v44 }
  0x9c   :  { %1410 = vmatpush3.bf16.msra.mxu1 %v1409_v45  ;;  %1380 = vmatprep.subr.bf16.mxu0 %v1379_v46 }
  0x9d   :  { %1412 = vmatprep.subr.bf16.mxu1 %v1411_v50 }
  0x9f   :  { %1382 = vmatpush3.bf16.msra.mxu0 %v1381_v56 }
  0xa0   :  { %1414 = vmatpush3.bf16.msra.mxu1 %v1413_v57  ;;  %1384 = vmatprep.subr.bf16.mxu0 %v1383_v58 }
  0xa1   :  { %1416 = vmatprep.subr.bf16.mxu1 %v1415_v62 }
  0xa3   :  { %1386 = vmatpush3.bf16.msra.mxu0 %v1385_v4 }
  0xa4   :  { %1418 = vmatpush3.bf16.msra.mxu1 %v1417_v5  ;;  %1388 = vmatprep.subr.bf16.mxu0 %v1387_v6 }
  0xa5   :  { %1420 = vmatprep.subr.bf16.mxu1 %v1419_v9 }
  0xa7   :  { %1390 = vmatpush3.bf16.msra.mxu0 %v1389_v12 }
  0xa8   :  { %1422 = vmatpush3.bf16.msra.mxu1 %v1421_v13 }
  0xaa   :  { %795 = vmatmul.mubr.f32.vlgmr.msra.gmra.mrb[6].mxu0 %v50_v14 }
  0xab   :  { %865 = vmatmul.mubr.f32.vlgmr.msra.gmra.mrb[6].mxu1 %v52_v15 }
 0x11d   :  { %v919_v16 = vpop.f32.mrb[0].mxu0 }
 0x11e   :  { %v954_v17 = vpop.f32.mrb[0].mxu1  ;;  %v920_v18 = vpop.f32.mrb[1].mxu0 }
 0x11f   :  { %v921_v19 = vadd.f32 %v920_v18, %v919_v16  ;;  %v955_v20 = vpop.f32.mrb[1].mxu1 }
 0x120   :  { %v956_v21 = vadd.f32 %v955_v20, %v954_v17 }
 0x122   :  { %v447_v22 = vadd.f32 %v956_v21, %v921_v19 }
 0x13d   :  { %v989_v23 = vpop.f32.mrb[2].mxu0 }
 0x13e   :  { %v990_v24 = vpop.f32.mrb[3].mxu0  ;;  %v1024_v25 = vpop.f32.mrb[2].mxu1 }
 0x13f   :  { %v991_v26 = vadd.f32 %v990_v24, %v989_v23  ;;  %v1025_v27 = vpop.f32.mrb[3].mxu1 }
 0x140   :  { %v1026_v28 = vadd.f32 %v1025_v27, %v1024_v25 }
 0x141   :  { %v517_v29 = vadd.f32 %v991_v26, %v447_v22 }
 0x143   :  { %v587_v30 = vadd.f32 %v1026_v28, %v517_v29 }
 0x15d   :  { %v1059_v31 = vpop.f32.mrb[4].mxu0 }
 0x15e   :  { %v1060_v32 = vpop.f32.mrb[5].mxu0  ;;  %v1094_v33 = vpop.f32.mrb[4].mxu1 }
 0x15f   :  { %v1061_v34 = vadd.f32 %v1060_v32, %v1059_v31  ;;  %v1095_v35 = vpop.f32.mrb[5].mxu1 }
 0x160   :  { %v1096_v36 = vadd.f32 %v1095_v35, %v1094_v33 }
 0x161   :  { %v657_v37 = vadd.f32 %v1061_v34, %v587_v30 }
 0x163   :  { %v727_v38 = vadd.f32 %v1096_v36, %v657_v37 }
 0x17d   :  { %v1129_v39 = vpop.f32.mrb[6].mxu0 }
 0x17e   :  { %v1130_v40 = vpop.f32.mrb[7].mxu0  ;;  %v1164_v41 = vpop.f32.mrb[6].mxu1 }
 0x17f   :  { %v1131_v42 = vadd.f32 %v1130_v40, %v1129_v39  ;;  %v1165_v43 = vpop.f32.mrb[7].mxu1 }
 0x180   :  { %v1166_v44 = vadd.f32 %v1165_v43, %v1164_v41 }
 0x181   :  { %v797_v45 = vadd.f32 %v1131_v42, %v727_v38 }
 0x183   :  { %v867_v46 = vadd.f32 %v1166_v44, %v797_v45 }
 0x185   :  { %870 = vst [vmem:[#allocation7] sm:$0xff] %v867_v46 }
 0x186   :  { %1483 = shalt.err (!%p1480_p6)
}
 0x187   :  { %s1484_s10 = scalar_lea.hbm %s1558_s2, 128 }
 0x188   :  { %p1485_p7 = scmp.ne.s32.totalorder %s1558_s2, %s1484_s10  ;;  %p1488_p8 = scmp.lt.u32.totalorder %s1484_s10, %s1558_s2 }
 0x18a   :  { %p1490_p9 = pnand %p1488_p8, %p1485_p7 }
 0x18c   :  { %1493 = shalt.err (!%p1490_p9)
}
 0x18d   :  { %880 = dma.vmem_to_hbm [thread:$0]  %s878_s6, 128, %s1558_s2, [#allocation4]  }
 0x18e   :  { %1498 = dma.done.wait [#allocation4], 128  }
 0x18f   :  { %1499 = vsyncadd [#allocation4], 4294967168 }
 0x190   :  { %884 = vsyncpa [#allocation3], 1 }
 0x191   :  { %885 = vsyncpa [#allocation6], 1 }
 0x192   :  { %886 = vsyncpa [#allocation4], 1 }

</bundles_post_ra>
